<compile_context>
chip_gen: v7x
topology: tpu7x:2x2x1
jax: 0.10.0
libtpu: 0.0.40
codegen_flags: <defaults>
</compile_context>

<pallas_src>
import math

import jax
import jax.numpy as jnp
from jax.experimental import pallas as pl
from jax.experimental.pallas import tpu as pltpu


# Scoped-VMEM target: <= 40 MiB leaves headroom for Mosaic internal scratch on
# v7x (64 MiB physical VMEM); v5e/v6e (128 MiB) are unaffected.
_VMEM_LIMIT = 40 * 1024 * 1024


# ----------------------------------------------------------------------------
# helpers
# ----------------------------------------------------------------------------
def _pick_tile(dim, target, aligns=(128, 16, 8)):
    """Largest divisor of `dim` that is <= target and a multiple of one of
    `aligns` (tried in order: MXU/lane 128, bf16 sublane pack 16, sublane 8),
    else the full dim (full-dimension blocks are always legal)."""
    if dim <= target:
        return dim
    for align in aligns:
        t = (target // align) * align
        while t >= align:
            if dim % t == 0:
                return t
            t -= align
    # TODO(synk): pad-and-mask path for awkward (prime-ish) dims instead of
    # falling back to a single full-dim block.
    return dim


# ----------------------------------------------------------------------------
# Fused QKV projection:  out[M, 3H] = x[M, K] @ w[K, 3H] + b[3H]
# ----------------------------------------------------------------------------
def _qkv_matmul_kernel(x_ref, w_ref, b_ref, o_ref):
    """x_ref: [tm, K]  w_ref: [K, tn]  b_ref: [1, tn] f32  o_ref: [tm, tn].
    Full-depth contraction: no reduction grid axis, no accumulator scratch."""
    o_ref[...] = (jnp.dot(x_ref[...], w_ref[...],
                          preferred_element_type=jnp.float32)
                  + b_ref[...]).astype(o_ref.dtype)


def pallas_qkv_projection(x, w_qkv, b_qkv, *, hidden_size, out_dtype):
    """x: [M, K] (compute dtype), w_qkv: [K, 3H], b_qkv: [3H] f32.
    Returns [M, 3H]: columns 0:H = Q (scale pre-folded), H:2H = K, 2H:3H = V."""
    M, K = x.shape
    H = hidden_size
    N = 3 * H
    assert w_qkv.shape == (K, N)

    in_b = jnp.dtype(x.dtype).itemsize
    out_b = jnp.dtype(out_dtype).itemsize
    budget = (3 * _VMEM_LIMIT) // 4          # headroom for internal scratch

    def footprint(tm, tn):                   # conservative: 2 buffers each
        return 2 * (tm * K * in_b + K * tn * in_b + tn * 4 + tm * tn * out_b)

    tm_target = 512                          # big row tiles: fewer steps,
    tm = _pick_tile(M, tm_target)            # weight streamed fewer times
    while footprint(tm, H) > budget and tm_target > 128:
        tm_target //= 2
        tm = _pick_tile(M, tm_target)
    # Whole 3H output width per step when the [K, 3H] weight fits VMEM
    # (true for all standard BERT sizes); x and w then stream from HBM once.
    tn = N if footprint(tm, N) <= budget else H
    # TODO(synk): re-introduce a K-reduction grid axis (tk a multiple of 256 on
    # v6e/v7x) only for very large hidden sizes where a [K, H] plane overflows.
    nj = N // tn
    grid = (nj, M // tm)                     # row-tile axis innermost

    return pl.pallas_call(
        _qkv_matmul_kernel,
        out_shape=jax.ShapeDtypeStruct((M, N), out_dtype),
        grid=grid,
        in_specs=[
            pl.BlockSpec((tm, K), lambda j, i: (i, 0)),
            pl.BlockSpec((K, tn), lambda j, i: (0, j)),
            pl.BlockSpec((1, tn), lambda j, i: (0, j)),
        ],
        out_specs=pl.BlockSpec((tm, tn), lambda j, i: (i, j)),
        compiler_params=pltpu.CompilerParams(
            dimension_semantics=("parallel", "parallel"),
            vmem_limit_bytes=_VMEM_LIMIT,
        ),
    )(x, w_qkv, b_qkv.reshape(1, N))


# ----------------------------------------------------------------------------
# Multi-head attention kernel: one (batch, query-tile) pair per grid step.
# ----------------------------------------------------------------------------
def _make_attn_kernel(num_heads, head_dim, out_dtype):
    def kernel(q_ref, k_ref, v_ref, m_ref, o_ref):
        # q_ref: [1, tq, H], k_ref/v_ref: [1, Sk, H] (column planes of the
        # fused [B, Sk, 3H] QKV tensor), m_ref: [1, 1|tq, Sk], o_ref: [1, tq, H].
        mask = m_ref[0].astype(jnp.float32)                    # [1|tq, Sk]
        for h in range(num_heads):                             # static unroll
            lo = h * head_dim
            q_h = q_ref[0, :, lo:lo + head_dim]                # [tq, Dh] (1/sqrt(Dh) pre-folded)
            k_h = k_ref[0, :, lo:lo + head_dim]                # [Sk, Dh]
            v_h = v_ref[0, :, lo:lo + head_dim]                # [Sk, Dh]
            # contract the Dh axes directly (q @ k^T without a k.T relayout)
            s = jax.lax.dot_general(q_h, k_h, (((1,), (1,)), ((), ())),
                                    preferred_element_type=jnp.float32)  # [tq, Sk]
            s = s + mask                                       # in-vreg broadcast
            s = s - jnp.max(s, axis=-1, keepdims=True)
            # TODO(synk): bf16 exp on v6e/v7x (bf16 EUP) once accuracy validated.
            p = jnp.exp(s)                                     # [tq, Sk] f32
            denom = jnp.sum(p, axis=-1, keepdims=True)         # [tq, 1]  f32
            ctx_h = jnp.dot(p.astype(v_h.dtype), v_h,
                            preferred_element_type=jnp.float32)  # [tq, Dh]
            # Deferred softmax normalization: scale the small [tq, Dh] context
            # (not the [tq, Sk] probs) and store this head's slice immediately
            # so only one head's f32 tiles are ever live (no concat, no spills).
            o_ref[0, :, lo:lo + head_dim] = (
                ctx_h * pl.reciprocal(denom, approx=True)).astype(out_dtype)
        # TODO(synk): attention-prob dropout is identity in eval mode; not applied.
    return kernel


def pallas_multihead_attention(q_src, kv_src, mask3, *, Sq, tq, num_heads,
                               head_dim, out_dtype, q_block_offset=0):
    """q_src/kv_src: [B, S*, 3H] fused QKV (Q cols 0:H, K cols H:2H, V cols 2H:3H).
    mask3: [B, 1|Sq, Sk] additive mask.  Returns [B, Sq, H]."""
    B, Sk, threeH = kv_src.shape
    H = num_heads * head_dim
    assert threeH == 3 * H
    mq = mask3.shape[1]
    grid = (B, Sq // tq)
    q_off = q_block_offset

    if mq == 1:
        mask_spec = pl.BlockSpec((1, 1, Sk), lambda b, i: (b, 0, 0))
    else:
        mask_spec = pl.BlockSpec((1, tq, Sk), lambda b, i: (b, i, 0))

    kernel = _make_attn_kernel(num_heads, head_dim, out_dtype)
    return pl.pallas_call(
        kernel,
        out_shape=jax.ShapeDtypeStruct((B, Sq, H), out_dtype),
        grid=grid,
        in_specs=[
            pl.BlockSpec((1, tq, H), lambda b, i: (b, i + q_off, 0)),   # Q cols
            # TODO(synk): pipeline_mode=pl.Buffered(1) for K/V on v7x (block
            # index is constant across the query-tile axis -> halves VMEM use).
            pl.BlockSpec((1, Sk, H), lambda b, i: (b, 0, 1)),           # K cols
            pl.BlockSpec((1, Sk, H), lambda b, i: (b, 0, 2)),           # V cols
            mask_spec,
        ],
        out_specs=pl.BlockSpec((1, tq, H), lambda b, i: (b, i, 0)),
        compiler_params=pltpu.CompilerParams(
            dimension_semantics=("parallel", "parallel"),
            vmem_limit_bytes=_VMEM_LIMIT,
        ),
    )(q_src, kv_src, kv_src, mask3)


# ----------------------------------------------------------------------------
# Module wrapper (num_qkv = 1, eval mode)
# ----------------------------------------------------------------------------
class BertSelfAttentionPallas:
    """JAX/Pallas re-implementation of the PyTorch BertSelfAttention."""

    def __init__(self, hidden_size, num_attention_heads, key,
                 compute_dtype=jnp.bfloat16):
        if hidden_size % num_attention_heads != 0:
            raise ValueError("hidden size must be a multiple of num heads")
        if hidden_size % 128 != 0:
            raise ValueError("hidden size must be a multiple of the TPU lane "
                             "width (128) for the fused-QKV column slicing")
        self.num_attention_heads = num_attention_heads
        self.attention_head_size = hidden_size // num_attention_heads
        self.all_head_size = hidden_size
        self.compute_dtype = compute_dtype

        ks = jax.random.split(key, 6)
        bound = 1.0 / math.sqrt(hidden_size)
        # torch nn.Linear weight is [out, in]; we store [in, out] (pre-transposed).
        self.wq = jax.random.uniform(ks[0], (hidden_size, hidden_size),
                                     jnp.float32, -bound, bound)
        self.bq = jax.random.uniform(ks[1], (hidden_size,), jnp.float32, -bound, bound)
        self.wk = jax.random.uniform(ks[2], (hidden_size, hidden_size),
                                     jnp.float32, -bound, bound)
        self.bk = jax.random.uniform(ks[3], (hidden_size,), jnp.float32, -bound, bound)
        self.wv = jax.random.uniform(ks[4], (hidden_size, hidden_size),
                                     jnp.float32, -bound, bound)
        self.bv = jax.random.uniform(ks[5], (hidden_size,), jnp.float32, -bound, bound)

        # Fused [H, 3H] weight / [3H] bias with the 1/sqrt(Dh) attention scale
        # folded into the Q projection (removes a per-tile VPU multiply).
        inv_sqrt_dh = 1.0 / math.sqrt(self.attention_head_size)
        self.w_qkv = jnp.concatenate(
            [self.wq * inv_sqrt_dh, self.wk, self.wv], axis=1).astype(compute_dtype)
        self.b_qkv = jnp.concatenate(
            [self.bq * inv_sqrt_dh, self.bk, self.bv]).astype(jnp.float32)

    def __call__(self, hidden_states, attention_mask, history_states=None):
        B, Sq, H = hidden_states.shape
        if history_states is None:
            x_states = hidden_states
        else:
            x_states = jnp.concatenate((history_states, hidden_states), axis=1)
        Sk = x_states.shape[1]

        cd = self.compute_dtype
        # One fused pass over the activations produces Q, K, V as [B, Sk, 3H].
        qkv = pallas_qkv_projection(
            x_states.reshape(B * Sk, H).astype(cd),
            self.w_qkv, self.b_qkv,
            hidden_size=H, out_dtype=cd,
        ).reshape(B, Sk, 3 * H)

        # Additive mask: accept [B,1,1,Sk] / [B,1,Sq,Sk] / [B,Sq,Sk] / [B,1,Sk] / [B,Sk].
        mask3 = jnp.asarray(attention_mask, jnp.float32).reshape(
            B, -1, attention_mask.shape[-1])
        if mask3.shape[1] not in (1, Sq) or mask3.shape[2] != Sk:
            raise ValueError(
                f"unsupported attention_mask shape {attention_mask.shape} "
                f"for Sq={Sq}, Sk={Sk}")
        if mask3.shape[1] > 1:
            # Per-query masks stream B*Sq*Sk values; bf16 halves that HBM
            # traffic (-10000-style additive masks tolerate bf16 rounding).
            mask3 = mask3.astype(jnp.bfloat16)

        # Bigger query tiles (fewer ~0.35us grid steps, better MXU M / batched
        # exp); keep 128 for long contexts where [tq, Sk] f32 scores grow.
        tq = _pick_tile(Sq, 128 if Sk >= 2048 else 256)
        if B * (Sq // tq) < 2:               # keep both v7x TensorCores busy
            tq_half = _pick_tile(Sq, max(tq // 2, 8))
            if Sq // tq_half >= 2:
                tq = tq_half

        if history_states is None:
            q_src, q_off = qkv, 0
        elif (Sk - Sq) % tq == 0 and tq % 8 == 0:
            # Linear is position-wise: Q of the current tokens == last Sq rows.
            q_src, q_off = qkv, (Sk - Sq) // tq
        else:
            # TODO(synk): a pl.Element row offset on the Q BlockSpec would avoid
            # this XLA copy for non-tile-aligned history offsets.
            q_src, q_off = qkv[:, Sk - Sq:, :], 0

        return pallas_multihead_attention(
            q_src, qkv, mask3,
            Sq=Sq, tq=tq,
            num_heads=self.num_attention_heads,
            head_dim=self.attention_head_size,
            out_dtype=hidden_states.dtype,
            q_block_offset=q_off,
        )


# ----------------------------------------------------------------------------
# Pure-JAX reference (exact torch math) for the correctness check
# ----------------------------------------------------------------------------
def _reference(module, hidden_states, attention_mask):
    B, S, H = hidden_states.shape
    nH, Dh = module.num_attention_heads, module.attention_head_size
    q = hidden_states @ module.wq + module.bq
    k = hidden_states @ module.wk + module.bk
    v = hidden_states @ module.wv + module.bv
    q = q.reshape(B, S, nH, Dh).transpose(0, 2, 1, 3)
    k = k.reshape(B, S, nH, Dh).transpose(0, 2, 1, 3)
    v = v.reshape(B, S, nH, Dh).transpose(0, 2, 1, 3)
    scores = jnp.einsum("bhqd,bhkd->bhqk", q / math.sqrt(Dh), k) + attention_mask
    probs = jax.nn.softmax(scores, axis=-1)
    ctx = jnp.einsum("bhqk,bhkd->bhqd", probs, v)
    return ctx.transpose(0, 2, 1, 3).reshape(B, S, H)


if __name__ == "__main__":
    B, S, H, nH = 2, 8, 128, 4

    key = jax.random.PRNGKey(0)
    k_param, k_hid, k_mask = jax.random.split(key, 3)

    hidden_states = jax.random.normal(k_hid, (B, S, H), jnp.float32)
    # Standard BERT additive mask: 0 for attended tokens, -10000 for padded ones.
    pad = (jax.random.uniform(k_mask, (B, 1, 1, S)) > 0.8).astype(jnp.float32)
    attention_mask = pad * -10000.0

    # f32 MXU-input path (tight check; tolerance covers approx reciprocal).
    mod_f32 = BertSelfAttentionPallas(H, nH, k_param, compute_dtype=jnp.float32)
    out_f32 = jax.block_until_ready(mod_f32(hidden_states, attention_mask))
    ref = _reference(mod_f32, hidden_states, attention_mask)
    assert out_f32.shape == (B, S, H)
    assert jnp.allclose(out_f32, ref, atol=2e-2, rtol=2e-2), float(
        jnp.max(jnp.abs(out_f32 - ref)))

    # bf16 MXU-input path (recommended on v6e/v7x): looser tolerance vs f32 ref.
    mod_bf16 = BertSelfAttentionPallas(H, nH, k_param, compute_dtype=jnp.bfloat16)
    out_bf16 = jax.block_until_ready(mod_bf16(hidden_states, attention_mask))
    assert out_bf16.shape == (B, S, H)
    assert jnp.allclose(out_bf16, ref, atol=1e-1, rtol=1e-1), float(
        jnp.max(jnp.abs(out_bf16 - ref)))

    print("KERNEL_OK")
</pallas_src>

<mosaic_0001>
module attributes {stable_mosaic.version = 11 : i64} {
  func.func @_qkv_matmul_kernel(%arg0: i32, %arg1: i32, %arg2: memref<16x128xf32, #tpu.memory_space<vmem>>, %arg3: memref<128x384xf32, #tpu.memory_space<vmem>>, %arg4: memref<1x384xf32, #tpu.memory_space<vmem>>, %arg5: memref<16x384xf32, #tpu.memory_space<vmem>>) attributes {dimension_semantics = [#tpu.dimension_semantics<parallel>, #tpu.dimension_semantics<parallel>], iteration_bounds = array<i64: 1, 1>, scalar_prefetch = 0 : i64, scratch_operands = 0 : i64, tpu.core_type = #tpu.core_type<tc>, window_params = [{transform_indices = @transform_0, window_bounds = array<i64: 16, 128>}, {transform_indices = @transform_1, window_bounds = array<i64: 128, 384>}, {transform_indices = @transform_2, window_bounds = array<i64: 1, 384>}, {transform_indices = @transform_3, window_bounds = array<i64: 16, 384>}]} {
    %c0 = arith.constant 0 : index
    %c0_0 = arith.constant 0 : index
    %0 = vector.load %arg2[%c0, %c0_0] : memref<16x128xf32, #tpu.memory_space<vmem>>, vector<16x128xf32>
    %c0_1 = arith.constant 0 : index
    %c0_2 = arith.constant 0 : index
    %1 = vector.load %arg3[%c0_1, %c0_2] : memref<128x384xf32, #tpu.memory_space<vmem>>, vector<128x384xf32>
    %cst = arith.constant dense<0.000000e+00> : vector<16x384xf32>
    %2 = tpu.matmul %0, %1, %cst {dimension_numbers = #tpu.dot_dimension_numbers<[1], [0], [0], [1], [0, 0, 1, 1], [], []>} : vector<16x128xf32>, vector<128x384xf32>, vector<16x384xf32> -> vector<16x384xf32>
    %c0_3 = arith.constant 0 : index
    %c0_4 = arith.constant 0 : index
    %3 = vector.load %arg4[%c0_3, %c0_4] : memref<1x384xf32, #tpu.memory_space<vmem>>, vector<1x384xf32>
    %4 = vector.broadcast %3 : vector<1x384xf32> to vector<16x384xf32>
    %5 = arith.addf %2, %4 : vector<16x384xf32>
    %c0_5 = arith.constant 0 : index
    %c0_6 = arith.constant 0 : index
    %6 = vector.load %arg5[%c0_5, %c0_6] : memref<16x384xf32, #tpu.memory_space<vmem>>, vector<16x384xf32>
    tpu.vector_store %arg5[%c0_5, %c0_6], %5 {strides = array<i32>} : memref<16x384xf32, #tpu.memory_space<vmem>>, vector<16x384xf32>,
    return
  }
  func.func @transform_0(%arg0: i32, %arg1: i32) -> (i32, i32) {
    %c0_i32 = arith.constant 0 : i32
    %c0_i32_0 = arith.constant 0 : i32
    return %arg1, %c0_i32 : i32, i32
  }
  func.func @transform_1(%arg0: i32, %arg1: i32) -> (i32, i32) {
    %c0_i32 = arith.constant 0 : i32
    %c0_i32_0 = arith.constant 0 : i32
    return %c0_i32, %arg0 : i32, i32
  }
  func.func @transform_2(%arg0: i32, %arg1: i32) -> (i32, i32) {
    %c0_i32 = arith.constant 0 : i32
    %c0_i32_0 = arith.constant 0 : i32
    return %c0_i32, %arg0 : i32, i32
  }
  func.func @transform_3(%arg0: i32, %arg1: i32) -> (i32, i32) {
    %c0_i32 = arith.constant 0 : i32
    return %arg1, %arg0 : i32, i32
  }
}

</mosaic_0001>

<bundles_post_ra>
// kernel: tpu_custom_call.1
= control target key start
LH: loop header
LB: loop body
LE: loop exit
PB: predicated region body
PF: predicated region fallthrough
CT: control target
= control target key end

     0   :  { %8 = vsyncpa [#allocation3], 0  ;;  %s558_s0 = inlined_call_operand.hbm [shape: f32[16,128], index: 0, kind: input, shape index: {}]   ;;  %s559_s1 = inlined_call_operand.hbm [shape: f32[128,384], index: 1, kind: input, shape index: {}]   ;;  %s560_s2 = inlined_call_operand.vmem [shape: f32[1,384], index: 2, kind: input, shape index: {}]   ;;  %s561_s3 = inlined_call_operand.hbm [shape: f32[16,384], index: 3, kind: output, shape index: {}]  }
   0x1   :  { %9 = vsyncpa [#allocation6], 0 }
   0x2   :  { %10 = vsyncpa [#allocation4], 0  ;;  %s483_s12 = smov [#allocation2]   ;;  %s411_s16 = scalar_lea.hbm %s558_s0, 256 }
   0x3   :  { %s16_s13 = sshll.u32 %s483_s12, 4  ;;  %p412_p0 = scmp.ne.s32.totalorder %s558_s0, %s411_s16  ;;  %s17_s13 = int_to_ptr.vmem [resolvable:$true] %s16_s13 }
   0x4   :  { %p415_p1 = scmp.lt.u32.totalorder %s411_s16, %s558_s0 }
   0x6   :  { %p417_p2 = pnand %p415_p1, %p412_p0 }
   0x8   :  { %420 = shalt.err (!%p417_p2)
}
   0x9   :  { %s421_s21 = scalar_lea.vmem %s17_s13, 256  ;;  %p426_p4 = scmp.lt.s32.totalorder %s17_s13, %s17_s13 }
   0xa   :  { %p422_p3 = scmp.ne.s32.totalorder %s17_s13, %s421_s21  ;;  %p427_p5 = scmp.lt.s32.totalorder %s421_s21, %s421_s21 }
   0xc   :  { %p428_p6 = por %p427_p5, %p426_p4 }
   0xe   :  { %p429_p7 = pnand %p428_p6, %p422_p3 }
  0x10   :  { %432 = shalt.err (!%p429_p7)
}
  0x11   :  { %s484_s22 = smov 128   ;;  %s485_s23 = smov 8  }
  0x12   :  { %22 = dma.hbm_to_vmem [thread:$0]  %s558_s0, 256, %s17_s13, [#allocation3], %s484_s22, %s484_s22, %s485_s23  }
  0x13   :  { %s486_s26 = smov [#allocation5]   ;;  %s433_s30 = scalar_lea.hbm %s559_s1, 6144 }
  0x14   :  { %s28_s27 = sshll.u32 %s486_s26, 4  ;;  %p434_p8 = scmp.ne.s32.totalorder %s559_s1, %s433_s30  ;;  %s29_s27 = int_to_ptr.vmem [resolvable:$true] %s28_s27 }
  0x15   :  { %p437_p9 = scmp.lt.u32.totalorder %s433_s30, %s559_s1 }
  0x17   :  { %p439_p10 = pnand %p437_p9, %p434_p8 }
  0x19   :  { %442 = shalt.err (!%p439_p10)
}
  0x1a   :  { %s443_s8 = scalar_lea.vmem %s29_s27, 6144  ;;  %p448_p12 = scmp.lt.s32.totalorder %s29_s27, %s29_s27 }
  0x1b   :  { %p444_p11 = scmp.ne.s32.totalorder %s29_s27, %s443_s8  ;;  %p449_p13 = scmp.lt.s32.totalorder %s443_s8, %s443_s8 }
  0x1d   :  { %p450_p0 = por %p449_p13, %p448_p12 }
  0x1f   :  { %p451_p1 = pnand %p450_p0, %p444_p11 }
  0x21   :  { %454 = shalt.err (!%p451_p1)
}
  0x22   :  { %s487_s0 = smov 384   ;;  %s488_s9 = smov 24  }
  0x23   :  { %34 = dma.hbm_to_vmem [thread:$0]  %s559_s1, 6144, %s29_s27, [#allocation6], %s487_s0, %s487_s0, %s488_s9  }
  0x24   :  { %477 = dma.done.wait [#allocation3], 256  }
  0x25   :  { %478 = vsyncadd [#allocation3], 4294967040 }
  0x26   :  { %479 = dma.done.wait [#allocation6], 6144  }
  0x27   :  { %480 = vsyncadd [#allocation6], 4294961152  ;;  %v489_v0 = vmov 0.0   ;;  %v46_v1 = vld [vmem:[#allocation5 + $0x8] sm:$0xff]  ;;  %v49_v2 = vld [vmem:[#allocation5 + $0x20] sm:$0xff]  ;;  %s490_s13 = smov [#allocation7]  }
  0x28   :  { %174 = vmatprep.mubr.f32.mxu0 %v489_v0  ;;  %v45_v3 = vld [vmem:[#allocation5] sm:$0xff]  ;;  %v339_v4 = vpack.c.bf16 %v49_v2, %v46_v1  ;;  %v48_v5 = vld [vmem:[#allocation5 + $0x18] sm:$0xff]  ;;  %v47_v6 = vld [vmem:[#allocation5 + $0x10] sm:$0xff]  ;;  %s273_s14 = sshll.u32 %s490_s13, 4  ;;  %s274_s14 = int_to_ptr.vmem [resolvable:$true] %s273_s14 }
  0x29   :  { %v50_v7 = vld [vmem:[#allocation5 + $0x28] sm:$0xff]  ;;  %v341_v8 = vpack.c.bf16 %v48_v5, %v45_v3  ;;  %v52_v10 = vld [vmem:[#allocation5 + $0x38] sm:$0xff]  ;;  %v55_v11 = vld [vmem:[#allocation5 + $0x50] sm:$0xff]  ;;  %p460_p3 = scmp.lt.s32.totalorder %s274_s14, %s274_s14 }
  0x2a   :  { %v371_v9 = vpack.c.bf16 %v50_v7, %v47_v6  ;;  %v51_v12 = vld [vmem:[#allocation5 + $0x30] sm:$0xff]  ;;  %340 = vmatprep.subr.bf16.mxu0 %v339_v4  ;;  %v343_v13 = vpack.c.bf16 %v55_v11, %v52_v10  ;;  %v54_v14 = vld [vmem:[#allocation5 + $0x48] sm:$0xff]  ;;  %v53_v15 = vld [vmem:[#allocation5 + $0x40] sm:$0xff] }
  0x2b   :  { %v56_v16 = vld [vmem:[#allocation5 + $0x58] sm:$0xff]  ;;  %342 = vmatpush1.bf16.msra.mxu0 %v341_v8  ;;  %v345_v17 = vpack.c.bf16 %v54_v14, %v51_v12  ;;  %v58_v19 = vld [vmem:[#allocation5 + $0x68] sm:$0xff]  ;;  %v61_v20 = vld [vmem:[#allocation5 + $0x80] sm:$0xff]  ;;  %v95_v12 = vlaneseq }
  0x2c   :  { %372 = vmatprep.subr.bf16.mxu1 %v371_v9  ;;  %v375_v18 = vpack.c.bf16 %v56_v16, %v53_v15  ;;  %v57_v21 = vld [vmem:[#allocation5 + $0x60] sm:$0xff]  ;;  %344 = vmatprep.subr.bf16.mxu0 %v343_v13  ;;  %v347_v22 = vpack.c.bf16 %v61_v20, %v58_v19  ;;  %v60_v23 = vld [vmem:[#allocation5 + $0x78] sm:$0xff]  ;;  %v59_v24 = vld [vmem:[#allocation5 + $0x70] sm:$0xff] }
  0x2d   :  { %374 = vmatpush3.bf16.msra.mxu1 %v371_v9  ;;  %v62_v25 = vld [vmem:[#allocation5 + $0x88] sm:$0xff]  ;;  %v64_v27 = vld [vmem:[#allocation5 + $0x98] sm:$0xff]  ;;  %v67_v28 = vld [vmem:[#allocation5 + $0xb0] sm:$0xff]  ;;  %v349_v31 = vpack.c.bf16 %v60_v23, %v57_v21  ;;  %v96_v13 = vshrl.u32 %v95_v12, 7 }
  0x2e   :  { %376 = vmatprep.subr.bf16.mxu1 %v375_v18  ;;  %v379_v26 = vpack.c.bf16 %v62_v25, %v59_v24  ;;  %v65_v29 = vld [vmem:[#allocation5 + $0xa0] sm:$0xff]  ;;  %v68_v30 = vld [vmem:[#allocation5 + $0xb8] sm:$0xff]  ;;  %v351_v32 = vpack.c.bf16 %v67_v28, %v64_v27  ;;  %v63_v33 = vld [vmem:[#allocation5 + $0x90] sm:$0xff] }
  0x2f   :  { %346 = vmatpush1.bf16.msra.mxu0 %v345_v17  ;;  %v66_v34 = vld [vmem:[#allocation5 + $0xa8] sm:$0xff]  ;;  %v383_v35 = vpack.c.bf16 %v68_v30, %v65_v29  ;;  %v73_v37 = vld [vmem:[#allocation5 + $0xe0] sm:$0xff]  ;;  %v71_v38 = vld [vmem:[#allocation5 + $0xd0] sm:$0xff]  ;;  %v97_v14 = vsub.s32 0, %v96_v13  ;;  %v101_v16 = vsub.s32 1, %v96_v13  ;;  %v105_v17 = vsub.s32 2, %v96_v13 }
  0x30   :  { %348 = vmatprep.subr.bf16.mxu0 %v347_v22  ;;  %v70_v36 = vld [vmem:[#allocation5 + $0xc8] sm:$0xff]  ;;  %v353_v40 = vpack.c.bf16 %v66_v34, %v63_v33  ;;  %v69_v42 = vld [vmem:[#allocation5 + $0xc0] sm:$0xff]  ;;  %v72_v43 = vld [vmem:[#allocation5 + $0xd8] sm:$0xff] }
  0x31   :  { %378 = vmatpush3.bf16.msra.mxu1 %v375_v18  ;;  %v74_v39 = vld [vmem:[#allocation5 + $0xe8] sm:$0xff]  ;;  %v355_v41 = vpack.c.bf16 %v73_v37, %v70_v36  ;;  %v76_v45 = vld [vmem:[#allocation5 + $0xf8] sm:$0xff]  ;;  %v79_v46 = vld [vmem:[#allocation5 + $0x110] sm:$0xff]  ;;  %v357_v49 = vpack.c.bf16 %v72_v43, %v69_v42 }
  0x32   :  { %380 = vmatprep.subr.bf16.mxu1 %v379_v26  ;;  %v387_v44 = vpack.c.bf16 %v74_v39, %v71_v38  ;;  %v77_v47 = vld [vmem:[#allocation5 + $0x100] sm:$0xff]  ;;  %v80_v48 = vld [vmem:[#allocation5 + $0x118] sm:$0xff]  ;;  %v359_v50 = vpack.c.bf16 %v79_v46, %v76_v45  ;;  %v75_v51 = vld [vmem:[#allocation5 + $0xf0] sm:$0xff] }
  0x33   :  { %350 = vmatpush1.bf16.msra.mxu0 %v349_v31  ;;  %v78_v52 = vld [vmem:[#allocation5 + $0x108] sm:$0xff]  ;;  %v43_v53 = vld [vmem:[#allocation2] sm:$0xff]  ;;  %v391_v54 = vpack.c.bf16 %v80_v48, %v77_v47  ;;  %v85_v56 = vld [vmem:[#allocation5 + $0x140] sm:$0xff] }
  0x34   :  { %352 = vmatprep.subr.bf16.mxu0 %v351_v32  ;;  %v82_v55 = vld [vmem:[#allocation5 + $0x128] sm:$0xff]  ;;  %336 = vmatprep.mubr.f32.mxu1 %v43_v53  ;;  %v83_v57 = vld [vmem:[#allocation5 + $0x130] sm:$0xff]  ;;  %v361_v59 = vpack.c.bf16 %v78_v52, %v75_v51  ;;  %v81_v61 = vld [vmem:[#allocation5 + $0x120] sm:$0xff] }
  0x35   :  { %382 = vmatpush3.bf16.msra.mxu1 %v379_v26  ;;  %v86_v58 = vld [vmem:[#allocation5 + $0x148] sm:$0xff]  ;;  %v363_v60 = vpack.c.bf16 %v85_v56, %v82_v55  ;;  %v84_v62 = vld [vmem:[#allocation5 + $0x138] sm:$0xff]  ;;  %v91_v2 = vld [vmem:[#allocation5 + $0x170] sm:$0xff] }
  0x36   :  { %384 = vmatprep.subr.bf16.mxu1 %v383_v35  ;;  %v395_v63 = vpack.c.bf16 %v86_v58, %v83_v57  ;;  %v88_v1 = vld [vmem:[#allocation5 + $0x158] sm:$0xff]  ;;  %v89_v3 = vld [vmem:[#allocation5 + $0x160] sm:$0xff]  ;;  %v365_v5 = vpack.c.bf16 %v84_v62, %v81_v61  ;;  %v87_v7 = vld [vmem:[#allocation5 + $0x150] sm:$0xff] }
  0x37   :  { %354 = vmatpush1.bf16.msra.mxu0 %v353_v40  ;;  %v92_v4 = vld [vmem:[#allocation5 + $0x178] sm:$0xff]  ;;  %v367_v6 = vpack.c.bf16 %v91_v2, %v88_v1  ;;  %v90_v8 = vld [vmem:[#allocation5 + $0x168] sm:$0xff]  ;;  %v93_v15 = vld [vmem:[%s560_s2] sm:$0x7]  ;;  %s455_s2 = scalar_lea.vmem %s274_s14, 768 }
  0x38   :  { %356 = vmatprep.subr.bf16.mxu0 %v355_v41  ;;  %v399_v9 = vpack.c.bf16 %v92_v4, %v89_v3  ;;  %v369_v10 = vpack.c.bf16 %v90_v8, %v87_v7  ;;  %v44_v11 = vld [vmem:[#allocation2 + $0x8] sm:$0xff]  ;;  %v98_v18 = vrot.slane %v93_v15, %v97_v14  ;;  %v102_v19 = vrot.slane %v93_v15, %v101_v16  ;;  %p456_p2 = scmp.ne.s32.totalorder %s274_s14, %s455_s2  ;;  %p461_p4 = scmp.lt.s32.totalorder %s455_s2, %s455_s2 }
  0x39   :  { %386 = vmatpush3.bf16.msra.mxu1 %v383_v35  ;;  %v106_v20 = vrot.slane %v93_v15, %v105_v17 }
  0x3a   :  { %388 = vmatprep.subr.bf16.mxu1 %v387_v44  ;;  %p462_p5 = por %p461_p4, %p460_p3 }
  0x3b   :  { %358 = vmatpush1.bf16.msra.mxu0 %v357_v49 }
  0x3c   :  { %360 = vmatprep.subr.bf16.mxu0 %v359_v50  ;;  %p463_p6 = pnand %p462_p5, %p456_p2 }
  0x3d   :  { %390 = vmatpush3.bf16.msra.mxu1 %v387_v44 }
  0x3e   :  { %392 = vmatprep.subr.bf16.mxu1 %v391_v54 }
  0x3f   :  { %362 = vmatpush1.bf16.msra.mxu0 %v361_v59 }
  0x40   :  { %364 = vmatprep.subr.bf16.mxu0 %v363_v60 }
  0x41   :  { %394 = vmatpush3.bf16.msra.mxu1 %v391_v54 }
  0x42   :  { %396 = vmatprep.subr.bf16.mxu1 %v395_v63 }
  0x43   :  { %366 = vmatpush1.bf16.msra.mxu0 %v365_v5 }
  0x44   :  { %368 = vmatprep.subr.bf16.mxu0 %v367_v6 }
  0x45   :  { %398 = vmatpush3.bf16.msra.mxu1 %v395_v63 }
  0x46   :  { %400 = vmatprep.subr.bf16.mxu1 %v399_v9 }
  0x47   :  { %370 = vmatpush1.bf16.msra.mxu0 %v369_v10 }
  0x49   :  { %402 = vmatpush3.bf16.msra.mxu1 %v399_v9 }
  0x4a   :  { %175 = vmatmul.mubr.f32.vlgmr.msra.gmra.mrb[0].mxu0 %v43_v53 }
  0x4b   :  { %180 = vmatprep.mubr.f32.mxu0 %v489_v0 }
  0x4c   :  { %337 = vmatmul.mubr.f32.vlgmr.msra.gmra.mrb[0].mxu1 %v44_v11 }
  0x4e   :  { %181 = vmatmul.mubr.f32.gmra.mrb[2].mxu0 %v44_v11 }
 0x11d   :  { %v176_v21 = vpop.f32.mrb[0].mxu0 }
 0x11e   :  { %v177_v22 = vadd.f32 %v176_v21, %v98_v18  ;;  %v178_v23 = vpop.f32.mrb[1].mxu0 }
 0x11f   :  { %v338_v24 = vpop.f32.mrb[0].mxu1  ;;  %v179_v25 = vadd.f32 %v178_v23, %v102_v19 }
 0x120   :  { %v259_v0 = vadd.f32 %v338_v24, %v106_v20  ;;  %v253_v26 = vpop.f32.mrb[1].mxu1  ;;  %262 = vst [vmem:[#allocation7] sm:$0xff] %v177_v22 }
 0x121   :  { %v254_v27 = vadd.f32 %v253_v26, %v106_v20  ;;  %263 = vst [vmem:[#allocation7 + $0x8] sm:$0xff] %v179_v25  ;;  %v182_v28 = vpop.f32.mrb[2].mxu0 }
 0x122   :  { %267 = vst [vmem:[#allocation7 + $0x28] sm:$0xff] %v259_v0  ;;  %v183_v29 = vadd.f32 %v182_v28, %v98_v18  ;;  %v184_v30 = vpop.f32.mrb[3].mxu0 }
 0x123   :  { %264 = vst [vmem:[#allocation7 + $0x10] sm:$0xff] %v254_v27  ;;  %v185_v31 = vadd.f32 %v184_v30, %v102_v19 }
 0x124   :  { %265 = vst [vmem:[#allocation7 + $0x18] sm:$0xff] %v183_v29 }
 0x125   :  { %266 = vst [vmem:[#allocation7 + $0x20] sm:$0xff] %v185_v31 }
 0x126   :  { %466 = shalt.err (!%p463_p6)
}
 0x127   :  { %s467_s17 = scalar_lea.hbm %s561_s3, 768 }
 0x128   :  { %p468_p7 = scmp.ne.s32.totalorder %s561_s3, %s467_s17  ;;  %p471_p8 = scmp.lt.u32.totalorder %s467_s17, %s561_s3 }
 0x12a   :  { %p473_p9 = pnand %p471_p8, %p468_p7 }
 0x12c   :  { %476 = shalt.err (!%p473_p9)
}
 0x12d   :  { %279 = dma.vmem_to_hbm [thread:$0]  %s274_s14, 768, %s561_s3, [#allocation4], %s487_s0, %s487_s0, %s488_s9  }
 0x12e   :  { %481 = dma.done.wait [#allocation4], 768  }
 0x12f   :  { %482 = vsyncadd [#allocation4], 4294966528 }
 0x130   :  { %283 = vsyncpa [#allocation3], 1 }
 0x131   :  { %284 = vsyncpa [#allocation6], 1 }
 0x132   :  { %285 = vsyncpa [#allocation4], 1 }

</bundles_post_ra>
